<compile_context>
chip_gen: v5e
topology: v5e:2x2
jax: 0.10.0
libtpu: 0.0.40
codegen_flags: <defaults>
</compile_context>

<pallas_src>
import jax
import jax.numpy as jnp
import numpy as np
from jax.experimental import pallas as pl
from jax.experimental.pallas import tpu as pltpu

_MiB = 1024 * 1024


def _copy_kernel(x_ref, o_ref):
    # Straight copy of the current tile (full-width vst when lane-dense).
    o_ref[...] = x_ref[...]


def _is_v7x() -> bool:
    try:
        return "v7" in jax.devices()[0].device_kind.lower()
    except Exception:
        return False


def _to_2d_shape(x: jax.Array):
    """Collapse x to a 2D (rows, cols) slab, lane-dense when possible."""
    total = x.size
    # Prefer a lane width that is a large multiple of 128 -> unmasked vst.
    for lane_w in (1024, 512, 256, 128):
        if total % lane_w == 0:
            return total // lane_w, lane_w
    # Element count not a 128-multiple: keep the last dim at full extent
    # (always legal) and tile only the collapsed leading dims.
    if x.ndim >= 2:
        return int(np.prod(x.shape[:-1])), int(x.shape[-1])
    return 1, int(total)


def _pick_rows_per_block(rows: int, cols: int, dtype_bytes: int, *, v7x: bool) -> int:
    # Sub-32-bit dtypes pack along sublanes: keep row blocks a multiple of
    # the packed sublane group (8 f32 / 16 bf16 / 32 int8-fp8).
    sub = max(8, 32 // dtype_bytes)
    target_bytes = (8 if v7x else 4) * _MiB
    total_bytes = rows * cols * dtype_bytes

    rpb = max(1, target_bytes // (cols * dtype_bytes))

    # v7x megacore balance: for non-trivial inputs force >= 2 grid blocks so
    # the "parallel" axis actually uses both TensorCores.
    if v7x and total_bytes > 2 * _MiB:
        rpb = min(rpb, max(1, rows // 2))

    if rpb >= rows:
        return rows  # single full-extent block (always legal)

    rpb = max(sub, (rpb // sub) * sub)

    # Prefer a block count that divides `rows` evenly (no ragged, masked-store
    # last block), but never shrink the block by more than 2x for it.
    for cand in range(rpb, max(sub, rpb // 2) - 1, -sub):
        if rows % cand == 0:
            return cand
    return rpb


def identity_map(x: jax.Array, *args, **kwargs) -> jax.Array:
    """IdentityMap.forward: pure pass-through (zero HBM traffic, no kernel)."""
    return x


def identity_map_pallas(x: jax.Array, *, donate_input: bool = False) -> jax.Array:
    """Pallas streaming-copy kernel preserving IdentityMap semantics.

    When the input buffer is donated there is nothing useful to copy
    (aliasing would not remove the 2*size bytes of HBM traffic), so we
    short-circuit and return x directly.
    """
    if donate_input or x.size == 0:
        return x

    orig_shape = x.shape
    rows, cols = _to_2d_shape(x)
    x2d = x.reshape(rows, cols)

    dtype_bytes = x2d.dtype.itemsize
    v7x = _is_v7x()
    rpb = _pick_rows_per_block(rows, cols, dtype_bytes, v7x=v7x)
    # TODO(synk): a pathologically huge, non-128-multiple last dim could make
    # even an 8-row block exceed VMEM; would need an HBM->HBM manual-DMA path.

    grid = (pl.cdiv(rows, rpb),)
    block = pl.BlockSpec((rpb, cols), lambda i: (i, 0))
    total_bytes = rows * cols * dtype_bytes

    out2d = pl.pallas_call(
        _copy_kernel,
        out_shape=jax.ShapeDtypeStruct((rows, cols), x2d.dtype),
        grid_spec=pl.GridSpec(
            grid=grid,
            in_specs=[block],
            out_specs=block,
        ),
        compiler_params=pltpu.CompilerParams(
            dimension_semantics=("parallel",),   # shards blocks across v7x's 2 TCs
            vmem_limit_bytes=48 * _MiB,          # 2 in + 2 out buffers <= 32 MiB
        ),
        cost_estimate=pl.CostEstimate(
            flops=0, transcendentals=0, bytes_accessed=2 * total_bytes),
    )(x2d)
    return out2d.reshape(orig_shape)


def identity_map_config():
    # Mirror of the PyTorch `config` property (metadata only; no compute).
    return {"mm_projector_type": "identity"}


if __name__ == "__main__":
    key = jax.random.PRNGKey(0)
    # Projector-style input: batch=2, seq=8, hidden=32 (128-multiple element
    # count -> lane-dense copy path).
    x = jax.random.normal(key, (2, 8, 32), dtype=jnp.float32)

    # 1) The real forward: pure pass-through (the #1 perf recommendation).
    y = identity_map(x)
    assert y is x

    # 2) Pallas streaming copy (lane-dense slab, row-tiled).
    y_copy = jax.block_until_ready(identity_map_pallas(x))
    assert y_copy.shape == x.shape and y_copy.dtype == x.dtype
    assert bool(jnp.array_equal(y_copy, x))

    # 3) Non-128-multiple element count -> row-tiled, full-last-dim path
    #    (previously a single-block VMEM-blowing fallback).
    x_odd = jax.random.normal(jax.random.PRNGKey(1), (2, 8, 33), dtype=jnp.float32)
    y_odd = jax.block_until_ready(identity_map_pallas(x_odd))
    assert y_odd.shape == x_odd.shape
    assert bool(jnp.array_equal(y_odd, x_odd))

    # 4) bf16 input exercises dtype-aware sublane rounding.
    x_bf16 = jax.random.normal(jax.random.PRNGKey(2), (4, 16, 64), dtype=jnp.bfloat16)
    y_bf16 = jax.block_until_ready(identity_map_pallas(x_bf16))
    assert y_bf16.dtype == jnp.bfloat16
    assert bool(jnp.array_equal(y_bf16, x_bf16))

    # 5) Donated input: short-circuit, no copy issued (zero HBM traffic).
    y_don = identity_map_pallas(x, donate_input=True)
    assert y_don is x

    assert identity_map_config() == {"mm_projector_type": "identity"}
    print("KERNEL_OK")
</pallas_src>

<mosaic_0001>
module attributes {stable_mosaic.version = 11 : i64} {
  func.func @_copy_kernel(%arg0: i32, %arg1: memref<1x512xf32, #tpu.memory_space<vmem>>, %arg2: memref<1x512xf32, #tpu.memory_space<vmem>>) attributes {dimension_semantics = [#tpu.dimension_semantics<parallel>], iteration_bounds = array<i64: 1>, scalar_prefetch = 0 : i64, scratch_operands = 0 : i64, tpu.core_type = #tpu.core_type<tc>, window_params = [{transform_indices = @transform_0, window_bounds = array<i64: 1, 512>}, {transform_indices = @transform_1, window_bounds = array<i64: 1, 512>}]} {
    %c0 = arith.constant 0 : index
    %c0_0 = arith.constant 0 : index
    %0 = vector.load %arg1[%c0, %c0_0] : memref<1x512xf32, #tpu.memory_space<vmem>>, vector<1x512xf32>
    %c0_1 = arith.constant 0 : index
    %c0_2 = arith.constant 0 : index
    %1 = vector.load %arg2[%c0_1, %c0_2] : memref<1x512xf32, #tpu.memory_space<vmem>>, vector<1x512xf32>
    tpu.vector_store %arg2[%c0_1, %c0_2], %0 {strides = array<i32>} : memref<1x512xf32, #tpu.memory_space<vmem>>, vector<1x512xf32>,
    return
  }
  func.func @transform_0(%arg0: i32) -> (i32, i32) {
    %c0_i32 = arith.constant 0 : i32
    %c0_i32_0 = arith.constant 0 : i32
    return %arg0, %c0_i32 : i32, i32
  }
  func.func @transform_1(%arg0: i32) -> (i32, i32) {
    %c0_i32 = arith.constant 0 : i32
    %c0_i32_0 = arith.constant 0 : i32
    return %arg0, %c0_i32 : i32, i32
  }
}

</mosaic_0001>

<bundles_post_ra>
// kernel: tpu_custom_call.1
= control target key start
LH: loop header
LB: loop body
LE: loop exit
PB: predicated region body
PF: predicated region fallthrough
CT: control target
= control target key end

     0   :  { %6 = vsyncpa [#allocation3], 0  ;;  %s118_s0 = inlined_call_operand.hbm [shape: f32[1,512], index: 0, kind: input, shape index: {}]   ;;  %s119_s1 = inlined_call_operand.hbm [shape: f32[1,512], index: 1, kind: output, shape index: {}]  }
   0x1   :  { %7 = vsyncpa [#allocation4], 0  ;;  %s13_s8 = sshll.u32 %s118_s0, 4  ;;  %s100_s9 = smov [#allocation2]   ;;  %s14_s8 = int_to_ptr.hbm [resolvable:$true] %s13_s8 }
   0x2   :  { %s15_s10 = sshll.u32 %s100_s9, 4  ;;  %s16_s10 = int_to_ptr.vmem [resolvable:$true] %s15_s10 }
   0x3   :  { %18 = dma.hbm_to_vmem [thread:$0]  %s14_s8, 64, %s16_s10, [#allocation3]  }
   0x4   :  { %96 = dma.done.wait [#allocation3], 64  }
   0x5   :  { %97 = vsyncadd [#allocation3], 4294967232  ;;  %v24_v0 = vlaneseq  ;;  %s101_s11 = smov [#allocation5]   ;;  %s36_s15 = sshll.u32 %s119_s1, 4  ;;  %v23_v1 = vld [vmem:[#allocation2] sm:$0xf]  ;;  %s37_s15 = int_to_ptr.hbm [resolvable:$true] %s36_s15 }
   0x6   :  { %s34_s12 = sshll.u32 %s101_s11, 4  ;;  %s35_s12 = int_to_ptr.vmem [resolvable:$true] %s34_s12 }
   0x7   :  { %vm26_vm0 = vcmp.lt.s32.totalorder %v24_v0, 512 }
   0x8   :  { %28 = vst.msk [vmem:[#allocation5] sm:$0xf] %vm26_vm0, %v23_v1 }
   0x9   :  { %39 = dma.vmem_to_hbm [thread:$0]  %s35_s12, 64, %s37_s15, [#allocation4]  }
   0xa   :  { %98 = dma.done.wait [#allocation4], 64  }
   0xb   :  { %99 = vsyncadd [#allocation4], 4294967232 }
   0xc   :  { %44 = vsyncpa [#allocation3], 1 }
   0xd   :  { %45 = vsyncpa [#allocation4], 1 }

</bundles_post_ra>
